<compile_context>
chip_gen: v5e
topology: v5e:2x2
jax: 0.10.0
libtpu: 0.0.40
codegen_flags: <defaults>
</compile_context>

<pallas_src>
import jax
import jax.numpy as jnp
from jax import lax
from jax.experimental import pallas as pl
from jax.experimental.pallas import tpu as pltpu


def _round_up(x, m):
    return ((x + m - 1) // m) * m


def attention_kernel(hid_ref, enc_ref, keep_ref, add_ref,
                     wh_ref, we_ref, ba_ref, wv_ref, out_ref):
    """One batch element per grid step.

    hid_ref  : (1, D)          feed dtype   decoder hidden state for batch b
    enc_ref  : (S_pad, E_pad)  feed dtype   encoder outputs for batch b (zero padded)
    keep_ref : (1, S_pad)      f32          1.0 keep / 0.0 drop (masked + pad lanes)
    add_ref  : (1, S_pad)      f32          0.0 / -1e10 (masked) / -1e30 (pad lanes)
    wh_ref   : (D, Dout)       feed dtype   hidden half of Linear `a` (transposed)
    we_ref   : (E_pad, Dout)   feed dtype   encoder half of Linear `a` (transposed, padded)
    ba_ref   : (1, Dout)       f32          bias of Linear `a`
    wv_ref   : (1, Dout)       f32          weight of Linear `v` (no bias)
    out_ref  : (1, S_pad)      f32          attention weights for batch b
    """
    # Linear `a` in split-weight form (cat order is [hidden, encoder_outputs]);
    # f32 accumulation on the MXU.
    hp = jnp.dot(hid_ref[...], wh_ref[...], preferred_element_type=jnp.float32)   # (1, Dout)
    ep = jnp.dot(enc_ref[...], we_ref[...], preferred_element_type=jnp.float32)   # (S_pad, Dout)

    # (1, Dout) rows broadcast over the S_pad sublanes for free (no replication matmul).
    energy = jnp.tanh(ep + hp + ba_ref[...])                                       # (S_pad, Dout) f32

    # Linear `v` as wv @ energy^T (NT matmul): S lands directly on lanes of (1, S_pad).
    scores = lax.dot_general(wv_ref[...], energy,
                             dimension_numbers=(((1,), (1,)), ((), ())),
                             preferred_element_type=jnp.float32)                   # (1, S_pad)

    # masked_fill(masked == 0, -1e10) + pad-lane kill, as one pre-baked multiply-add.
    scores = scores * keep_ref[...] + add_ref[...]

    # Softmax over the src-sequence lanes; exact divide (denominator >= 1 by construction).
    m = jnp.max(scores, axis=-1, keepdims=True)
    e = jnp.exp(scores - m)
    out_ref[...] = e / jnp.sum(e, axis=-1, keepdims=True)


def attention_forward(hidden, encoder_outputs, masked, Wa, ba, Wv,
                      feed_dtype=jnp.bfloat16):
    """Layout prep (padding + free views) and one batch-gridded pallas_call."""
    S, B, E = encoder_outputs.shape
    Bh, D = hidden.shape
    Dout = Wa.shape[0]
    assert Bh == B

    S_pad = _round_up(S, 128)     # lane-dense score/output width (also a sublane multiple)
    E_pad = _round_up(E, 128)     # lane-aligned encoder feature width

    # --- layout prep: zero pad + free (S,B,E)->(S, B*E) view (no HBM transpose) --------
    enc_p = jnp.zeros((S_pad, B, E_pad), feed_dtype)
    enc_p = enc_p.at[:S, :, :E].set(encoder_outputs.astype(feed_dtype))
    enc2 = enc_p.reshape(S_pad, B * E_pad)                       # lane index = b*E_pad + e

    hid3 = hidden.astype(feed_dtype).reshape(B, 1, D)

    # --- split-weight form of Linear `a` (cat order [hidden, encoder_outputs]) ---------
    wh = Wa[:, :D].T.astype(feed_dtype)                                      # (D, Dout)
    we_p = jnp.zeros((E_pad, Dout), feed_dtype).at[:E, :].set(
        Wa[:, D:].T.astype(feed_dtype))                                      # (E_pad, Dout)
    ba2 = ba.reshape(1, Dout).astype(jnp.float32)
    wv2 = Wv.reshape(1, Dout).astype(jnp.float32)

    # --- pre-baked mask rows: keep*score + add == masked_fill(masked == 0, -1e10),
    #     with -1e30 on padded lanes s >= S so they vanish from the softmax -------------
    valid = (jnp.arange(S_pad) < S)[None, :]                                  # (1, S_pad)
    mask_pad = jnp.zeros((B, S_pad), jnp.int32).at[:, :S].set(masked.astype(jnp.int32))
    keep = jnp.where(valid & (mask_pad != 0), 1.0, 0.0).astype(jnp.float32)
    add = jnp.where(valid,
                    jnp.where(mask_pad != 0, 0.0, -1e10),
                    -1e30).astype(jnp.float32)
    keep3 = keep.reshape(B, 1, S_pad)
    add3 = add.reshape(B, 1, S_pad)

    out3 = pl.pallas_call(
        attention_kernel,
        out_shape=jax.ShapeDtypeStruct((B, 1, S_pad), jnp.float32),
        grid=(B,),
        in_specs=[
            pl.BlockSpec((None, 1, D), lambda b: (b, 0, 0)),        # hidden row (per batch)
            pl.BlockSpec((S_pad, E_pad), lambda b: (0, b)),         # encoder slab (per batch)
            pl.BlockSpec((None, 1, S_pad), lambda b: (b, 0, 0)),    # keep row
            pl.BlockSpec((None, 1, S_pad), lambda b: (b, 0, 0)),    # add row
            pl.BlockSpec((D, Dout), lambda b: (0, 0)),              # wh   (resident)
            pl.BlockSpec((E_pad, Dout), lambda b: (0, 0)),          # we   (resident)
            pl.BlockSpec((1, Dout), lambda b: (0, 0)),              # ba   (resident)
            pl.BlockSpec((1, Dout), lambda b: (0, 0)),              # wv   (resident)
        ],
        out_specs=pl.BlockSpec((None, 1, S_pad), lambda b: (b, 0, 0)),
        compiler_params=pltpu.CompilerParams(
            dimension_semantics=("parallel",)),                     # batch across v7x's 2 TCs
    )(hid3, enc2, keep3, add3, wh, we_p, ba2, wv2)

    return out3[:, 0, :S]


def attention_reference(hidden, encoder_outputs, masked, Wa, ba, Wv):
    """Pure-JAX replica of the PyTorch forward, for correctness checking."""
    S = encoder_outputs.shape[0]
    B, D = hidden.shape
    h_rep = jnp.broadcast_to(hidden[:, None, :], (B, S, D))
    enc_p = jnp.transpose(encoder_outputs, (1, 0, 2))
    cat = jnp.concatenate([h_rep, enc_p], axis=2)
    energy = jnp.tanh(cat @ Wa.T + ba)
    scores = jnp.squeeze(energy @ Wv.T, axis=-1)
    scores = jnp.where(masked == 0, -1e10, scores)
    return jax.nn.softmax(scores, axis=1)


if __name__ == "__main__":
    # Small shapes consistent with the module
    enc_hid_dim = 16
    enc_n_directions = 2
    dec_hid_dim = 32
    B, S = 2, 8
    E = enc_hid_dim * enc_n_directions     # 32
    D = dec_hid_dim                        # 32
    Dout = dec_hid_dim                     # 32

    key = jax.random.PRNGKey(0)
    k_h, k_e, k_wa, k_ba, k_wv = jax.random.split(key, 5)

    hidden = jax.random.normal(k_h, (B, D), dtype=jnp.float32)
    encoder_outputs = jax.random.normal(k_e, (S, B, E), dtype=jnp.float32)
    # mask: batch 0 fully valid, batch 1 has trailing padding positions
    masked = jnp.ones((B, S), dtype=jnp.int32).at[1, 5:].set(0)

    # Deterministic parameter init (PyTorch nn.Linear default: U(-1/sqrt(fan_in), +))
    in_a = E + D
    a_bound = 1.0 / jnp.sqrt(jnp.float32(in_a))
    Wa = jax.random.uniform(k_wa, (Dout, in_a), minval=-a_bound, maxval=a_bound,
                            dtype=jnp.float32)
    ba = jax.random.uniform(k_ba, (Dout,), minval=-a_bound, maxval=a_bound,
                            dtype=jnp.float32)
    v_bound = 1.0 / jnp.sqrt(jnp.float32(Dout))
    Wv = jax.random.uniform(k_wv, (1, Dout), minval=-v_bound, maxval=v_bound,
                            dtype=jnp.float32)

    ref = attention_reference(hidden, encoder_outputs, masked, Wa, ba, Wv)

    # f32 feed: matches the PyTorch forward (tolerance is conservative; the softmax
    # divide is now exact and there are no approximate permutation matmuls left).
    out_f32 = jax.block_until_ready(
        attention_forward(hidden, encoder_outputs, masked, Wa, ba, Wv,
                          feed_dtype=jnp.float32))
    assert out_f32.shape == (B, S)
    assert jnp.allclose(out_f32, ref, atol=1e-4, rtol=1e-4), (out_f32, ref)

    # bf16 feed (default; recommended for v6e / mandatory-for-fit on v7x): encoder stream
    # and `a` weights in bf16, f32 accumulation, f32 score/softmax path.
    out_bf16 = jax.block_until_ready(
        attention_forward(hidden, encoder_outputs, masked, Wa, ba, Wv,
                          feed_dtype=jnp.bfloat16))
    assert out_bf16.shape == (B, S)
    assert jnp.allclose(out_bf16, ref, atol=2e-2, rtol=2e-2), (out_bf16, ref)

    print("KERNEL_OK")
</pallas_src>

<mosaic_0001>
module attributes {stable_mosaic.version = 11 : i64} {
  func.func @attention_kernel(%arg0: i32, %arg1: memref<1x1x32xf32, #tpu.memory_space<vmem>>, %arg2: memref<128x128xf32, #tpu.memory_space<vmem>>, %arg3: memref<1x1x128xf32, #tpu.memory_space<vmem>>, %arg4: memref<1x1x128xf32, #tpu.memory_space<vmem>>, %arg5: memref<32x32xf32, #tpu.memory_space<vmem>>, %arg6: memref<128x32xf32, #tpu.memory_space<vmem>>, %arg7: memref<1x32xf32, #tpu.memory_space<vmem>>, %arg8: memref<1x32xf32, #tpu.memory_space<vmem>>, %arg9: memref<1x1x128xf32, #tpu.memory_space<vmem>>) attributes {dimension_semantics = [#tpu.dimension_semantics<parallel>], iteration_bounds = array<i64: 2>, scalar_prefetch = 0 : i64, scratch_operands = 0 : i64, tpu.core_type = #tpu.core_type<tc>, window_params = [{transform_indices = @transform_0, window_bounds = array<i64: 1, 1, 32>}, {transform_indices = @transform_1, window_bounds = array<i64: 128, 128>}, {transform_indices = @transform_2, window_bounds = array<i64: 1, 1, 128>}, {transform_indices = @transform_3, window_bounds = array<i64: 1, 1, 128>}, {pipeline_mode = #tpu.pipeline_mode<synchronous>, transform_indices = @transform_4, window_bounds = array<i64: 32, 32>}, {pipeline_mode = #tpu.pipeline_mode<synchronous>, transform_indices = @transform_5, window_bounds = array<i64: 128, 32>}, {pipeline_mode = #tpu.pipeline_mode<synchronous>, transform_indices = @transform_6, window_bounds = array<i64: 1, 32>}, {pipeline_mode = #tpu.pipeline_mode<synchronous>, transform_indices = @transform_7, window_bounds = array<i64: 1, 32>}, {transform_indices = @transform_8, window_bounds = array<i64: 1, 1, 128>}]} {
    %c0 = arith.constant 0 : index
    %c0_0 = arith.constant 0 : index
    %c0_1 = arith.constant 0 : index
    %0 = vector.load %arg1[%c0, %c0_0, %c0_1] : memref<1x1x32xf32, #tpu.memory_space<vmem>>, vector<1x1x32xf32>
    %1 = vector.shape_cast %0 : vector<1x1x32xf32> to vector<1x32xf32>
    %c0_2 = arith.constant 0 : index
    %c0_3 = arith.constant 0 : index
    %2 = vector.load %arg5[%c0_2, %c0_3] : memref<32x32xf32, #tpu.memory_space<vmem>>, vector<32x32xf32>
    %cst = arith.constant dense<0.000000e+00> : vector<1x32xf32>
    %3 = tpu.matmul %1, %2, %cst {dimension_numbers = #tpu.dot_dimension_numbers<[1], [0], [0], [1], [0, 0, 1, 1], [], []>} : vector<1x32xf32>, vector<32x32xf32>, vector<1x32xf32> -> vector<1x32xf32>
    %c0_4 = arith.constant 0 : index
    %c0_5 = arith.constant 0 : index
    %4 = vector.load %arg2[%c0_4, %c0_5] : memref<128x128xf32, #tpu.memory_space<vmem>>, vector<128x128xf32>
    %c0_6 = arith.constant 0 : index
    %c0_7 = arith.constant 0 : index
    %5 = vector.load %arg6[%c0_6, %c0_7] : memref<128x32xf32, #tpu.memory_space<vmem>>, vector<128x32xf32>
    %cst_8 = arith.constant dense<0.000000e+00> : vector<128x32xf32>
    %6 = tpu.matmul %4, %5, %cst_8 {dimension_numbers = #tpu.dot_dimension_numbers<[1], [0], [0], [1], [0, 0, 1, 1], [], []>} : vector<128x128xf32>, vector<128x32xf32>, vector<128x32xf32> -> vector<128x32xf32>
    %7 = vector.broadcast %3 : vector<1x32xf32> to vector<128x32xf32>
    %8 = arith.addf %6, %7 : vector<128x32xf32>
    %c0_9 = arith.constant 0 : index
    %c0_10 = arith.constant 0 : index
    %9 = vector.load %arg7[%c0_9, %c0_10] : memref<1x32xf32, #tpu.memory_space<vmem>>, vector<1x32xf32>
    %10 = vector.broadcast %9 : vector<1x32xf32> to vector<128x32xf32>
    %11 = arith.addf %8, %10 : vector<128x32xf32>
    %12 = math.tanh %11 : vector<128x32xf32>
    %c0_11 = arith.constant 0 : index
    %c0_12 = arith.constant 0 : index
    %13 = vector.load %arg8[%c0_11, %c0_12] : memref<1x32xf32, #tpu.memory_space<vmem>>, vector<1x32xf32>
    %cst_13 = arith.constant dense<0.000000e+00> : vector<1x128xf32>
    %14 = tpu.matmul %13, %12, %cst_13 {dimension_numbers = #tpu.dot_dimension_numbers<[1], [1], [0], [0], [0, 0, 1, 0], [], []>} : vector<1x32xf32>, vector<128x32xf32>, vector<1x128xf32> -> vector<1x128xf32>
    %c0_14 = arith.constant 0 : index
    %c0_15 = arith.constant 0 : index
    %c0_16 = arith.constant 0 : index
    %15 = vector.load %arg3[%c0_14, %c0_15, %c0_16] : memref<1x1x128xf32, #tpu.memory_space<vmem>>, vector<1x1x128xf32>
    %16 = vector.shape_cast %15 : vector<1x1x128xf32> to vector<1x128xf32>
    %17 = arith.mulf %14, %16 : vector<1x128xf32>
    %c0_17 = arith.constant 0 : index
    %c0_18 = arith.constant 0 : index
    %c0_19 = arith.constant 0 : index
    %18 = vector.load %arg4[%c0_17, %c0_18, %c0_19] : memref<1x1x128xf32, #tpu.memory_space<vmem>>, vector<1x1x128xf32>
    %19 = vector.shape_cast %18 : vector<1x1x128xf32> to vector<1x128xf32>
    %20 = arith.addf %17, %19 : vector<1x128xf32>
    %cst_20 = arith.constant dense<0xFF800000> : vector<1xf32>
    %21 = vector.multi_reduction <maximumf>, %20, %cst_20 [1] : vector<1x128xf32> to vector<1xf32>
    %22 = vector.shape_cast %21 : vector<1xf32> to vector<1x1xf32>
    %23 = vector.broadcast %22 : vector<1x1xf32> to vector<1x128xf32>
    %24 = arith.subf %20, %23 : vector<1x128xf32>
    %25 = math.exp %24 : vector<1x128xf32>
    %cst_21 = arith.constant dense<0.000000e+00> : vector<1xf32>
    %26 = vector.multi_reduction <add>, %25, %cst_21 [1] : vector<1x128xf32> to vector<1xf32>
    %27 = vector.shape_cast %26 : vector<1xf32> to vector<1x1xf32>
    %28 = vector.broadcast %27 : vector<1x1xf32> to vector<1x128xf32>
    %29 = arith.divf %25, %28 : vector<1x128xf32>
    %c0_22 = arith.constant 0 : index
    %c0_23 = arith.constant 0 : index
    %c0_24 = arith.constant 0 : index
    %30 = vector.load %arg9[%c0_22, %c0_23, %c0_24] : memref<1x1x128xf32, #tpu.memory_space<vmem>>, vector<1x1x128xf32>
    %31 = vector.shape_cast %30 : vector<1x1x128xf32> to vector<1x128xf32>
    %32 = vector.shape_cast %29 : vector<1x128xf32> to vector<1x1x128xf32>
    tpu.vector_store %arg9[%c0_22, %c0_23, %c0_24], %32 {strides = array<i32>} : memref<1x1x128xf32, #tpu.memory_space<vmem>>, vector<1x1x128xf32>,
    return
  }
  func.func @transform_0(%arg0: i32) -> (i32, i32, i32) {
    %c0_i32 = arith.constant 0 : i32
    %c0_i32_0 = arith.constant 0 : i32
    %c0_i32_1 = arith.constant 0 : i32
    return %arg0, %c0_i32, %c0_i32_0 : i32, i32, i32
  }
  func.func @transform_1(%arg0: i32) -> (i32, i32) {
    %c0_i32 = arith.constant 0 : i32
    %c0_i32_0 = arith.constant 0 : i32
    return %c0_i32, %arg0 : i32, i32
  }
  func.func @transform_2(%arg0: i32) -> (i32, i32, i32) {
    %c0_i32 = arith.constant 0 : i32
    %c0_i32_0 = arith.constant 0 : i32
    %c0_i32_1 = arith.constant 0 : i32
    return %arg0, %c0_i32, %c0_i32_0 : i32, i32, i32
  }
  func.func @transform_3(%arg0: i32) -> (i32, i32, i32) {
    %c0_i32 = arith.constant 0 : i32
    %c0_i32_0 = arith.constant 0 : i32
    %c0_i32_1 = arith.constant 0 : i32
    return %arg0, %c0_i32, %c0_i32_0 : i32, i32, i32
  }
  func.func @transform_4(%arg0: i32) -> (i32, i32) {
    %c0_i32 = arith.constant 0 : i32
    %c0_i32_0 = arith.constant 0 : i32
    %c0_i32_1 = arith.constant 0 : i32
    return %c0_i32, %c0_i32_0 : i32, i32
  }
  func.func @transform_5(%arg0: i32) -> (i32, i32) {
    %c0_i32 = arith.constant 0 : i32
    %c0_i32_0 = arith.constant 0 : i32
    %c0_i32_1 = arith.constant 0 : i32
    return %c0_i32, %c0_i32_0 : i32, i32
  }
  func.func @transform_6(%arg0: i32) -> (i32, i32) {
    %c0_i32 = arith.constant 0 : i32
    %c0_i32_0 = arith.constant 0 : i32
    %c0_i32_1 = arith.constant 0 : i32
    return %c0_i32, %c0_i32_0 : i32, i32
  }
  func.func @transform_7(%arg0: i32) -> (i32, i32) {
    %c0_i32 = arith.constant 0 : i32
    %c0_i32_0 = arith.constant 0 : i32
    %c0_i32_1 = arith.constant 0 : i32
    return %c0_i32, %c0_i32_0 : i32, i32
  }
  func.func @transform_8(%arg0: i32) -> (i32, i32, i32) {
    %c0_i32 = arith.constant 0 : i32
    %c0_i32_0 = arith.constant 0 : i32
    %c0_i32_1 = arith.constant 0 : i32
    return %arg0, %c0_i32, %c0_i32_0 : i32, i32, i32
  }
}

</mosaic_0001>

<bundles_post_ra>
// kernel: tpu_custom_call.1
= control target key start
LH: loop header
LB: loop body
LE: loop exit
PB: predicated region body
PF: predicated region fallthrough
CT: control target
= control target key end

     0   :  { %13 = vsyncpa [#allocation3], 0  ;;  %s1311_s0 = inlined_call_operand.vmem [shape: f32[2,1,32], index: 0, kind: input, shape index: {}]   ;;  %s1312_s1 = inlined_call_operand.hbm [shape: f32[128,256], index: 1, kind: input, shape index: {}]   ;;  %s1313_s2 = inlined_call_operand.vmem [shape: f32[2,1,128], index: 2, kind: input, shape index: {}]   ;;  %s1314_s3 = inlined_call_operand.vmem [shape: f32[2,1,128], index: 3, kind: input, shape index: {}]   ;;  %s1315_s4 = inlined_call_operand.vmem [shape: f32[32,32], index: 4, kind: input, shape index: {}]   ;;  %s1316_s5 = inlined_call_operand.vmem [shape: f32[128,32], index: 5, kind: input, shape index: {}]   ;;  %s1317_s6 = inlined_call_operand.vmem [shape: f32[1,32], index: 6, kind: input, shape index: {}]   ;;  %s1318_s7 = inlined_call_operand.vmem [shape: f32[1,32], index: 7, kind: input, shape index: {}]   ;;  %s1319_s8 = inlined_call_operand.hbm [shape: f32[2,1,128], index: 8, kind: output, shape index: {}]  }
   0x1   :  { %15 = vsyncpa [#allocation3 + $0x1], 0 }
   0x2   :  { %16 = vsyncpa [#allocation4], 0 }
   0x3   :  { %18 = vsyncpa [#allocation4 + $0x1], 0  ;;  %s1028_s27 = smov 0   ;;  %s1030_s28 = smov 0  }
   0x4   :  { %s1032_s29 = smov 0   ;;  %s1034_s30 = smov 0  }
   0x5 LB: > { %1321 = sst [smem:[#allocation8_spill]] %s974_s29  ;;  %s1049_s9 = sadd.s32 4294967295, %s978_s30   ;;  %s978_s30 = sphi %s1034_s30, %s1332_s30   ;;  %s974_s29 = sphi %s1032_s29, %s1329_s29   ;;  %s970_s28 = sphi %s1030_s28, %s1331_s28   ;;  %s966_s27 = sphi %s1028_s27, %s1330_s27  }
   0x6   : > { %s737_s10 = sadd.s32 4294967294, %s978_s30   ;;  %s1053_s11 = sadd.s32 1, %s978_s30  }
   0x7   : > { %s57_s12 = sadd.s32 1, %s974_s29  ;;  %s54_s13 = ssub.s32 %s978_s30, %s1053_s11 }
   0x8   : > { %p64_p0 = scmp.ne.s32.totalorder %s974_s29, %s970_s28  ;;  %p55_p1 = scmp.eq.s32.totalorder %s54_s13, 0 }
   0x9   : > { %p65_p2 = scmp.eq.s32.totalorder %s978_s30, 0  ;;  %p70_p3 = scmp.ne.s32.totalorder %s970_s28, %s966_s27 }
   0xa   : > { %p71_p4 = scmp.eq.s32.totalorder %s1049_s9, 0  ;;  %p230_p7 = scmp.eq.s32.totalorder %s1049_s9, 1 }
   0xb   : > { %s1065_s14 = scalar_select %p55_p1, %s974_s29, %s57_s12  }
   0xc   : > { %p1067_p5 = por %p65_p2, %p64_p0  ;;  %p1071_p6 = por %p71_p4, %p70_p3 }
   0xd   : > { %1322 = sst [smem:[#allocation9_spill]] %s1065_s14  ;;  %p236_p8 = scmp.eq.s32.totalorder %s737_s10, 1 }
   0xe   : > { %p739_p9 = scmp.ge.s32.totalorder %s978_s30, 2  ;;  %p808_p10 = scmp.lt.s32.totalorder %s978_s30, 2 }
   0xf   : > { %p1078_p11 = por %p230_p7, %p64_p0  ;;  %p1082_p12 = por %p236_p8, %p70_p3 }
  0x10   : > { %s274_s19 = sand.u32 1, %s974_s29   ;;  %s741_s20 = sshll.u32 %s978_s30, 3 }
  0x11   : > { %s740_s21 = sshll.u32 %s274_s19, 7  ;;  %s282_s24 = scalar_lea.hbm %s1312_s1, %s741_s20 }
  0x12   : > { %s283_s25 = sshll.u32 %s282_s24, 4  ;;  %s278_s26 = scalar_lea.vmem [#allocation2], %s740_s21  ;;  %s284_s25 = int_to_ptr.hbm [resolvable:$true] %s283_s25 }
  0x13   : > { %s285_s10 = sshll.u32 %s278_s26, 4  ;;  %p1093_p13 = pnand %p808_p10, %p1067_p5  ;;  %s286_s10 = int_to_ptr.vmem [resolvable:$true] %s285_s10 }
  0x14   : > { %p742_p0 = scmp.ge.s32.totalorder %s978_s30, 1  ;;  %s275_s13 = scalar_lea.sflag [#allocation3], %s274_s19 }
  0x15   : > { %s882_s14 = sshra.s32 %s284_s25, 4  ;;  %p886_p2 = pneg %p1093_p13  ;;  %s883_s14 = int_to_ptr.hbm [resolvable:$true] %s882_s14 }
  0x16   : > { %s884_s29 = scalar_lea.hbm %s883_s14, 128  ;;  %s889_s22 = scalar_lea.hbm %s1312_s1, 256 }
  0x17   : > { %p885_p1 = scmp.ne.s32.totalorder %s883_s14, %s884_s29  ;;  %p890_p5 = scmp.lt.s32.totalorder %s883_s14, %s1312_s1 }
  0x18   : > { %p891_p7 = scmp.lt.s32.totalorder %s889_s22, %s884_s29 }
  0x19   : > { %p887_p3 = pnand %p886_p2, %p885_p1 }
  0x1a   : > { %p892_p8 = por %p891_p7, %p890_p5 }
  0x1b   : > { %p888_p4 = pneg %p887_p3 }
  0x1d   : > { %p893_p10 = pnand %p892_p8, %p888_p4 }
  0x1f   : > { %896 = shalt.err (!%p893_p10)
}
  0x20   : > { %s980_s19 = smov 256   ;;  %s981_s24 = smov 128  }
  0x21   : > { %s982_s26 = smov 8   ;;  %p305_p1 = scmp.lt.s32.totalorder %s978_s30, 3 }
  0x22   : > { %803 = dma.hbm_to_vmem [thread:$0]  (!%p1093_p13), %s284_s25, 2048, %s286_s10, %s275_s13, %s980_s19, %s981_s24, %s982_s26  }
  0x23   : > { %p306_p2 = pnand %p742_p0, %p305_p1 }
  0x24   : > { %s1112_s20 = sand.u32 (!%p306_p2), 1, %s970_s28  }
  0x25   : > { %309 = sbr.rel (%p306_p2) target bundleno = 724 (0x2d4), region = 52  ;;  %s743_s29 = sshll.u32 (!%p306_p2), %s1112_s20, 7 }
  0x26   : > { %s312_s14 = scalar_lea.sflag (!%p306_p2), [#allocation3], %s1112_s20  ;;  %s1116_s21 = scalar_lea.vmem (!%p306_p2), [#allocation2], %s743_s29 }
  0x2a   : > { %957 = dma.done.wait (%p1071_p6), %s312_s14, 2048  }
  0x2b   : > { %959 = vsyncadd (%p1071_p6), %s312_s14, 4294965248  ;;  %p357_p13 = scmp.lt.s32.totalorder %s1049_s9, 1  ;;  %v426_v0 = vld [vmem:[%s1316_s5 + $0x78] sm:$0xff]  ;;  %v425_v1 = vld [vmem:[%s1316_s5 + $0x70] sm:$0xff]  ;;  %vm371_vm0 = vcmask 261120   ;;  %vm605_vm1 = vcmask 1040384   ;;  %s640_s23 = scalar_lea.hbm %s1319_s8, %s1049_s9 }
  0x2c   : > { %765 = vmatpush.msra.mxu3 %v426_v0  ;;  %v370_v2 = vld [vmem:[%s1315_s4 + $0x18] sm:$0xff]  ;;  %764 = vmatpush.msra.mxu1 %v426_v0  ;;  %v424_v3 = vld [vmem:[%s1316_s5 + $0x68] sm:$0xff]  ;;  %v369_v4 = vld [vmem:[%s1315_s4 + $0x10] sm:$0xff]  ;;  %s356_s16 = scalar_lea.vmem [#allocation5], %s1112_s20  ;;  %s644_s24 = sshll.u32 %s640_s23, 4  ;;  %s645_s24 = int_to_ptr.hbm [resolvable:$true] %s644_s24 }
  0x2d   : > { %s1130_s22 = scalar_select %p357_p13, %s1049_s9, 1  ;;  %387 = vmatpush.msra.mxu0 %v370_v2  ;;  %v368_v5 = vld [vmem:[%s1315_s4 + $0x8] sm:$0xff]  ;;  %v423_v6 = vld [vmem:[%s1316_s5 + $0x60] sm:$0xff]  ;;  %v422_v8 = vld [vmem:[%s1316_s5 + $0x58] sm:$0xff] }
  0x2e   : > { %767 = vmatpush.msra.mxu3 %v425_v1  ;;  %766 = vmatpush.msra.mxu1 %v425_v1  ;;  %v367_v7 = vld [vmem:[%s1315_s4] sm:$0xff]  ;;  %v421_v10 = vld [vmem:[%s1316_s5 + $0x50] sm:$0xff]  ;;  %v420_v11 = vld [vmem:[%s1316_s5 + $0x48] sm:$0xff]  ;;  %s642_s19 = sshll.u32 %s356_s16, 4  ;;  %s926_s26 = sshra.s32 %s645_s24, 4  ;;  %s643_s19 = int_to_ptr.vmem [resolvable:$true] %s642_s19  ;;  %s927_s26 = int_to_ptr.hbm [resolvable:$true] %s926_s26 }
  0x2f   : > { %388 = vmatpush.msra.mxu0 %v369_v4  ;;  %s359_s15 = scalar_lea.vmem %s1311_s0, %s1130_s22  ;;  %v419_v12 = vld [vmem:[%s1316_s5 + $0x40] sm:$0xff]  ;;  %v418_v13 = vld [vmem:[%s1316_s5 + $0x38] sm:$0xff]  ;;  %v417_v14 = vld [vmem:[%s1316_s5 + $0x30] sm:$0xff]  ;;  %s362_s25 = scalar_lea.vmem %s1313_s2, %s1130_s22 }
  0x30   : > { %769 = vmatpush.msra.mxu3 %v424_v3  ;;  %768 = vmatpush.msra.mxu1 %v424_v3  ;;  %v366_v9 = vld [vmem:[%s359_s15] sm:$0x1]  ;;  %v416_v15 = vld [vmem:[%s1316_s5 + $0x28] sm:$0xff]  ;;  %v414_v17 = vld [vmem:[%s1316_s5 + $0x18] sm:$0xff]  ;;  %s365_s13 = scalar_lea.vmem %s1314_s3, %s1130_s22  ;;  %s928_s29 = scalar_lea.hbm %s927_s26, 1 }
  0x31   : > { %389 = vmatpush.msra.mxu0 %v368_v5  ;;  %v415_v16 = vld [vmem:[%s1316_s5 + $0x20] sm:$0xff]  ;;  %v413_v18 = vld [vmem:[%s1316_s5 + $0x10] sm:$0xff]  ;;  %v412_v19 = vld [vmem:[%s1316_s5 + $0x8] sm:$0xff]  ;;  %p929_p6 = scmp.ne.s32.totalorder %s927_s26, %s928_s29  ;;  %p933_p4 = scmp.lt.s32.totalorder %s927_s26, %s1319_s8 }
  0x32   : > { %771 = vmatpush.msra.mxu3 %v423_v6  ;;  %770 = vmatpush.msra.mxu1 %v423_v6  ;;  %v411_v20 = vld [vmem:[%s1316_s5] sm:$0xff]  ;;  %v405_v21 = vld [vmem:[%s1116_s21 + $0x50] sm:$0xff]  ;;  %v400_v22 = vld [vmem:[%s1116_s21 + $0x28] sm:$0xff] }
  0x33   : > { %390 = vmatpush.msra.mxu0 %v367_v7  ;;  %v406_v23 = vld [vmem:[%s1116_s21 + $0x58] sm:$0xff]  ;;  %v395_v24 = vld [vmem:[%s1116_s21] sm:$0xff]  ;;  %v401_v25 = vld [vmem:[%s1116_s21 + $0x30] sm:$0xff]  ;;  %p930_p0 = pnand %p929_p6, %p1078_p11 }
  0x34   : > { %773 = vmatpush.msra.mxu3 %v422_v8  ;;  %772 = vmatpush.msra.mxu1 %v422_v8  ;;  %v407_v26 = vld [vmem:[%s1116_s21 + $0x60] sm:$0xff]  ;;  %v396_v27 = vld [vmem:[%s1116_s21 + $0x8] sm:$0xff]  ;;  %v402_v28 = vld [vmem:[%s1116_s21 + $0x38] sm:$0xff] }
  0x35   : > { %428 = vmatpush.msrb.mxu0 %v426_v0  ;;  %v408_v29 = vld [vmem:[%s1116_s21 + $0x68] sm:$0xff]  ;;  %v397_v30 = vld [vmem:[%s1116_s21 + $0x10] sm:$0xff]  ;;  %v403_v31 = vld [vmem:[%s1116_s21 + $0x40] sm:$0xff]  ;;  %p931_p3 = pneg %p930_p0 }
  0x36   : > { %744 = vmatmul.msk.f32.vlgmr.msra.gmra.mxu0 %vm371_vm0, %v366_v9  ;;  %775 = vmatpush.msra.mxu3 %v421_v10  ;;  %v409_v32 = vld [vmem:[%s1116_s21 + $0x70] sm:$0xff]  ;;  %v398_v33 = vld [vmem:[%s1116_s21 + $0x18] sm:$0xff]  ;;  %v404_v34 = vld [vmem:[%s1116_s21 + $0x48] sm:$0xff] }
  0x37   : > { %429 = vmatpush.msrb.mxu0 %v425_v1  ;;  %774 = vmatpush.msra.mxu1 %v421_v10  ;;  %v410_v35 = vld [vmem:[%s1116_s21 + $0x78] sm:$0xff]  ;;  %v399_v36 = vld [vmem:[%s1116_s21 + $0x20] sm:$0xff]  ;;  %s632_s21 = scalar_lea.sflag [#allocation4], %s1112_s20 }
  0x38   : > { %777 = vmatpush.msra.mxu3 %v420_v11  ;;  %v1214_v49 = vld [vmem:[%s1317_s6] ss:$0 sm:$0xff] }
  0x39   : > { %430 = vmatpush.msrb.mxu0 %v424_v3  ;;  %776 = vmatpush.msra.mxu1 %v420_v11 }
  0x3a   : > { %779 = vmatpush.msra.mxu3 %v419_v12 }
  0x3b   : > { %431 = vmatpush.msrb.mxu0 %v423_v6  ;;  %778 = vmatpush.msra.mxu1 %v419_v12 }
  0x3c   : > { %781 = vmatpush.msra.mxu3 %v418_v13 }
  0x3d   : > { %432 = vmatpush.msrb.mxu0 %v422_v8  ;;  %780 = vmatpush.msra.mxu1 %v418_v13 }
  0x3e   : > { %783 = vmatpush.msra.mxu3 %v417_v14 }
  0x3f   : > { %433 = vmatpush.msrb.mxu0 %v421_v10  ;;  %782 = vmatpush.msra.mxu1 %v417_v14 }
  0x40   : > { %785 = vmatpush.msra.mxu3 %v416_v15 }
  0x41   : > { %434 = vmatpush.msrb.mxu0 %v420_v11  ;;  %784 = vmatpush.msra.mxu1 %v416_v15 }
  0x42   : > { %787 = vmatpush.msra.mxu3 %v415_v16 }
  0x43   : > { %435 = vmatpush.msrb.mxu0 %v419_v12  ;;  %786 = vmatpush.msra.mxu1 %v415_v16 }
  0x44   : > { %789 = vmatpush.msra.mxu3 %v414_v17 }
  0x45   : > { %436 = vmatpush.msrb.mxu0 %v418_v13  ;;  %788 = vmatpush.msra.mxu1 %v414_v17 }
  0x46   : > { %791 = vmatpush.msra.mxu3 %v413_v18 }
  0x47   : > { %437 = vmatpush.msrb.mxu0 %v417_v14  ;;  %790 = vmatpush.msra.mxu1 %v413_v18 }
  0x48   : > { %793 = vmatpush.msra.mxu3 %v412_v19 }
  0x49   : > { %438 = vmatpush.msrb.mxu0 %v416_v15  ;;  %792 = vmatpush.msra.mxu1 %v412_v19 }
  0x4a   : > { %795 = vmatpush.msra.mxu3 %v411_v20 }
  0x4b   : > { %439 = vmatpush.msrb.mxu0 %v415_v16  ;;  %474 = vmatmul.f32.vlgmr.msra.gmra.mxu3 %v405_v21 }
  0x4c   : > { %794 = vmatpush.msra.mxu1 %v411_v20 }
  0x4d   : > { %440 = vmatpush.msrb.mxu0 %v414_v17  ;;  %459 = vmatmul.f32.vlgmr.msra.gmra.mxu1 %v400_v22 }
  0x4f   : > { %441 = vmatpush.msrb.mxu0 %v413_v18 }
  0x51   : > { %442 = vmatpush.msrb.mxu0 %v412_v19 }
  0x53   : > { %443 = vmatpush.msrb.mxu0 %v411_v20  ;;  %477 = vmatmul.f32.gmra.mxu3 %v406_v23 }
  0x54   : > { %444 = vmatmul.f32.vlgmr.msrb.gmra.mxu0 %v395_v24 }
  0x55   : > { %462 = vmatmul.f32.gmra.mxu1 %v401_v25 }
  0x5b   : > { %480 = vmatmul.f32.gmra.mxu3 %v407_v26 }
  0x5c   : > { %447 = vmatmul.f32.gmra.mxu0 %v396_v27 }
  0x5d   : > { %465 = vmatmul.f32.gmra.mxu1 %v402_v28 }
  0x63   : > { %483 = vmatmul.f32.gmra.mxu3 %v408_v29 }
  0x64   : > { %450 = vmatmul.f32.gmra.mxu0 %v397_v30 }
  0x65   : > { %468 = vmatmul.f32.gmra.mxu1 %v403_v31 }
  0x6b   : > { %486 = vmatmul.f32.gmra.mxu3 %v409_v32 }
  0x6c   : > { %453 = vmatmul.f32.gmra.mxu0 %v398_v33 }
  0x6d   : > { %471 = vmatmul.f32.gmra.mxu1 %v404_v34 }
  0x73   : > { %489 = vmatmul.f32.gmra.mxu3 %v410_v35 }
  0x74   : > { %456 = vmatmul.f32.gmra.mxu0 %v399_v36 }
  0xb3   : > { %v392_v43 = vpop.f32.mrf.mxu0 }
  0xb4   : > { %v1209_v47 = vperm.slane %v392_v43, 0  ;;  %v603_v43 = vld [vmem:[%s365_s13] sm:$0x1] }
  0xca   : > { %v460_v40 = vpop.f32.mrf.mxu1 }
  0xcb   : > { %v461_v17 = vadd.f32 %v460_v40, %v1209_v47  ;;  %v529_v40 = vld [vmem:[%s1318_s7] sm:$0x1] }
  0xcd   : > { %v502_v21 = vadd.f32 %v1214_v49, %v461_v17 }
  0xce   : > { %v475_v37 = vpop.f32.mrf.mxu3 }
  0xcf   : > { %v476_v63 = vadd.f32 %v475_v37, %v1209_v47 }
  0xd1   : > { %v1207_v45 = vpop.f32.mrf.mxu0  ;;  %v507_v4 = vadd.f32 %v1214_v49, %v476_v63 }
  0xd2   : > { %v463_v42 = vpop.f32.mrf.mxu1  ;;  %v446_v33 = vadd.f32 %v1207_v45, %v1209_v47 }
  0xd3   : > { %v464_v14 = vadd.f32 %v463_v42, %v1209_v47 }
  0xd4   : > { %v497_v36 = vadd.f32 %v1214_v49, %v446_v33 }
  0xd5   : > { %v503_v18 = vadd.f32 %v1214_v49, %v464_v14 }
  0xd6   : > { %v478_v38 = vpop.f32.mrf.mxu3 }
  0xd7   : > { %v479_v60 = vadd.f32 %v478_v38, %v1209_v47 }
  0xd9   : > { %v448_v55 = vpop.f32.mrf.mxu0  ;;  %v508_v0 = vadd.f32 %v1214_v49, %v479_v60 }
  0xda   : > { %v466_v46 = vpop.f32.mrf.mxu1  ;;  %v449_v30 = vadd.f32 %v448_v55, %v1209_v47 }
  0xdb   : > { %v467_v11 = vadd.f32 %v466_v46, %v1209_v47 }
  0xdc   : > { %v498_v34 = vadd.f32 %v1214_v49, %v449_v30 }
  0xdd   : > { %v504_v15 = vadd.f32 %v1214_v49, %v467_v11 }
  0xde   : > { %v481_v39 = vpop.f32.mrf.mxu3 }
  0xdf   : > { %v482_v57 = vadd.f32 %v481_v39, %v1209_v47 }
  0xe1   : > { %v509_v61 = vadd.f32 %v1214_v49, %v482_v57  ;;  %v451_v1 = vpop.f32.mrf.mxu0 }
  0xe2   : > { %v469_v56 = vpop.f32.mrf.mxu1  ;;  %v452_v27 = vadd.f32 %v451_v1, %v1209_v47 }
  0xe3   : > { %v470_v7 = vadd.f32 %v469_v56, %v1209_v47 }
  0xe4   : > { %v499_v31 = vadd.f32 %v1214_v49, %v452_v27 }
  0xe5   : > { %v505_v12 = vadd.f32 %v1214_v49, %v470_v7 }
  0xe6   : > { %v484_v41 = vpop.f32.mrf.mxu3 }
  0xe7   : > { %v485_v53 = vadd.f32 %v484_v41, %v1209_v47  ;;  %v601_v41 = vld [vmem:[%s362_s25] sm:$0x1]  ;;  %s932_s25 = scalar_lea.hbm %s1319_s8, 2 }
  0xe8   : > { %p934_p5 = scmp.lt.s32.totalorder %s932_s25, %s928_s29 }
  0xe9   : > { %v510_v58 = vadd.f32 %v1214_v49, %v485_v53  ;;  %v454_v10 = vpop.f32.mrf.mxu0 }
  0xea   : > { %v472_v2 = vpop.f32.mrf.mxu1  ;;  %v455_v24 = vadd.f32 %v454_v10, %v1209_v47  ;;  %p935_p7 = por %p934_p5, %p933_p4 }
  0xeb   : > { %v473_v5 = vadd.f32 %v472_v2, %v1209_v47 }
  0xec   : > { %v500_v28 = vadd.f32 %v1214_v49, %v455_v24  ;;  %p936_p8 = pnand %p935_p7, %p931_p3 }
  0xed   : > { %v506_v8 = vadd.f32 %v1214_v49, %v473_v5 }
  0xee   : > { %v487_v44 = vpop.f32.mrf.mxu3 }
  0xef   : > { %v488_v50 = vadd.f32 %v487_v44, %v1209_v47 }
  0xf1   : > { %v511_v54 = vadd.f32 %v1214_v49, %v488_v50  ;;  %v457_v19 = vpop.f32.mrf.mxu0 }
  0xf2   : > { %v458_v22 = vadd.f32 %v457_v19, %v1209_v47 }
  0xf4   : > { %v501_v25 = vadd.f32 %v1214_v49, %v458_v22 }
  0xf6   : > { %v490_v48 = vpop.f32.mrf.mxu3 }
  0xf7   : > { %v491_v51 = vadd.f32 %v490_v48, %v1209_v47 }
  0xf9   : > { %v512_v52 = vadd.f32 %v1214_v49, %v491_v51 }
  0xfb   : > { %846 = vtanh.f32 %v512_v52 }
  0xfc   : > { %848 = vtanh.f32 %v511_v54 }
  0xfd   : > { %850 = vtanh.f32 %v510_v58 }
  0xfe   : > { %852 = vtanh.f32 %v509_v61 }
  0xff   : > { %854 = vtanh.f32 %v508_v0 }
 0x100   : > { %856 = vtanh.f32 %v507_v4 }
 0x101   : > { %v847_v59 = vpop.eup %846  ;;  %858 = vtanh.f32 %v506_v8 }
 0x102   : > { %745 = vmatpush.xpose.msk.msra.mxu2 %vm371_vm0, %v847_v59  ;;  %v849_v62 = vpop.eup %848  ;;  %860 = vtanh.f32 %v505_v12 }
 0x103   : > { %v851_v3 = vpop.eup %850  ;;  %862 = vtanh.f32 %v504_v15 }
 0x104   : > { %v853_v6 = vpop.eup %852  ;;  %864 = vtanh.f32 %v503_v18 }
 0x105   : > { %v855_v9 = vpop.eup %854  ;;  %866 = vtanh.f32 %v502_v21 }
 0x106   : > { %746 = vmatpush.xpose.msk.msra.mxu2 %vm371_vm0, %v849_v62  ;;  %v857_v13 = vpop.eup %856  ;;  %868 = vtanh.f32 %v501_v25 }
 0x107   : > { %v859_v16 = vpop.eup %858  ;;  %870 = vtanh.f32 %v500_v28 }
 0x108   : > { %v861_v20 = vpop.eup %860  ;;  %872 = vtanh.f32 %v499_v31 }
 0x109   : > { %v863_v23 = vpop.eup %862  ;;  %874 = vtanh.f32 %v498_v34 }
 0x10a   : > { %747 = vmatpush.xpose.msk.msra.mxu2 %vm371_vm0, %v851_v3  ;;  %v865_v26 = vpop.eup %864  ;;  %876 = vtanh.f32 %v497_v36 }
 0x10b   : > { %v867_v29 = vpop.eup %866 }
 0x10c   : > { %v869_v32 = vpop.eup %868 }
 0x10d   : > { %v871_v35 = vpop.eup %870 }
 0x10e   : > { %748 = vmatpush.xpose.msk.msra.mxu2 %vm371_vm0, %v853_v6  ;;  %v873_v37 = vpop.eup %872 }
 0x10f   : > { %v875_v38 = vpop.eup %874 }
 0x110   : > { %v877_v39 = vpop.eup %876 }
 0x112   : > { %749 = vmatpush.xpose.msk.msra.mxu2 %vm371_vm0, %v855_v9 }
 0x116   : > { %750 = vmatpush.xpose.msk.msra.mxu2 %vm371_vm0, %v857_v13 }
 0x11a   : > { %751 = vmatpush.xpose.msk.msra.mxu2 %vm371_vm0, %v859_v16 }
 0x11e   : > { %752 = vmatpush.xpose.msk.msra.mxu2 %vm371_vm0, %v861_v20 }
 0x122   : > { %753 = vmatpush.xpose.msk.msra.mxu2 %vm371_vm0, %v863_v23 }
 0x126   : > { %754 = vmatpush.xpose.msk.msra.mxu2 %vm371_vm0, %v865_v26 }
 0x12a   : > { %755 = vmatpush.xpose.msk.msra.mxu2 %vm371_vm0, %v867_v29 }
 0x12e   : > { %756 = vmatpush.xpose.msk.msra.mxu2 %vm371_vm0, %v869_v32 }
 0x132   : > { %757 = vmatpush.xpose.msk.msra.mxu2 %vm371_vm0, %v871_v35 }
 0x136   : > { %758 = vmatpush.xpose.msk.msra.mxu2 %vm371_vm0, %v873_v37 }
 0x13a   : > { %759 = vmatpush.xpose.msk.msra.mxu2 %vm371_vm0, %v875_v38 }
 0x13e   : > { %760 = vmatpush.xpose.msk.msra.mxu2 %vm371_vm0, %v877_v39 }
 0x141   : > { %761 = vmatmul.msk.f32.vlgmr.msra.gmra.mxu2 %vm371_vm0, %v529_v40 }
 0x1c4   : > { %v598_v42 = vpop.f32.mrf.mxu2 }
 0x1c5   : > { %v602_v44 = vmul.f32 %v601_v41, %v598_v42 }
 0x1c7   : > { %v604_v45 = vadd.f32 %v603_v43, %v602_v44 }
 0x1c9   : > { %v606_v46 = vsel %vm605_vm1, %v604_v45, -inf }
 0x1ca   : > { %607 = vmax.xlane.f32.xlu0 %v606_v46 }
 0x23d   : > { %v608_v47 = vpop.xlane.xlu0 %607 }
 0x23e   : > { %v609_v48 = vsub.f32 %v604_v45, %v608_v47 }
 0x240   : > { %v610_v49 = vmul.f32 1.442695, %v609_v48 }
 0x242   : > { %878 = vpow2.f32 %v610_v49 }
 0x248   : > { %v879_v50 = vpop.eup %878 }
 0x249   : > { %v612_v51 = vsel %vm605_vm1, %v879_v50, 0.0 }
 0x24a   : > { %613 = vadd.xlane.f32.xlu0 %v612_v51 }
 0x2bd   : > { %v614_v52 = vpop.xlane.xlu0 %613 }
 0x2be   : > { %880 = vrcp.f32 %v614_v52  ;;  %v626_v56 = vand.u32 2147483648, %v614_v52  ;;  %v624_v58 = vand.u32 2147483647, %v614_v52  ;;  %vm620_vm3 = vweird.f32 %v614_v52 }
 0x2c0   : > { %v627_v60 = vor.u32 1.1754944e-38, %v626_v56  ;;  %vm625_vm5 = vcmp.eq.f32.partialorder %v624_v58, 8.507059e+37 }
 0x2c4   : > { %v881_v53 = vpop.eup %880 }
 0x2c5   : > { %v616_v54 = vmul.f32 %v881_v53, %v614_v52  ;;  %vm621_vm2 = vweird.f32 %v881_v53 }
 0x2c6   : > { %vm622_vm4 = vmor %vm620_vm3, %vm621_vm2 }
 0x2c7   : > { %v617_v55 = vsub.f32 1.0, %v616_v54 }
 0x2c9   : > { %v618_v57 = vmul.f32 %v881_v53, %v617_v55 }
 0x2cb   : > { %v619_v59 = vadd.f32 %v881_v53, %v618_v57 }
 0x2cd   : > { %v623_v61 = vsel %vm622_vm4, %v881_v53, %v619_v59 }
 0x2ce   : > { %v628_v62 = vsel %vm625_vm5, %v627_v60, %v623_v61 }
 0x2cf   : > { %v629_v63 = vmul.f32 %v879_v50, %v628_v62 }
 0x2d1   : > { %630 = vst [vmem:[%s356_s16] sm:$0x1] %v629_v63 }
 0x2d2   : > { %939 = shalt.err (!%p936_p8)
}
 0x2d3   : > { %798 = dma.vmem_to_hbm [thread:$0]  (%p1078_p11), %s643_s19, 16, %s645_s24, %s632_s21  }
 0x2d4 PF: > { %s656_s20 = sand.u32 1, %s966_s27   ;;  %p805_p10 = pnand %p739_p9, %p1082_p12 }
 0x2d5   : > { %s657_s13 = scalar_lea.sflag [#allocation4], %s656_s20 }
 0x2d6   : > { %p806_p1 = pneg %p805_p10 }
 0x2d8   : > { %961 = dma.done.wait (%p806_p1), %s657_s13, 16  }
 0x2d9   : > { %963 = vsyncadd (%p806_p1), %s657_s13, 4294967280  ;;  %s1328_s22 = sld [smem:[#allocation8_spill]]  ;;  %p21_p2 = scmp.ge.s32.totalorder %s1053_s11, 4  }
 0x2da   : > { %s1329_s29 = sld [smem:[#allocation9_spill]]  ;;  %s1330_s27 = smov %s970_s28 }
 0x2db   : > { %s1332_s30 = smov %s1053_s11  ;;  %23 = sbr.rel (!%p21_p2) target bundleno = 5 (0x5), region = 106 }
 0x2df   : > { %s1331_s28 = smov %s1328_s22 }
 0x2e0   :  { %662 = vsyncpa [#allocation3], 1 }
 0x2e1   :  { %664 = vsyncpa [#allocation3 + $0x1], 1 }
 0x2e2   :  { %665 = vsyncpa [#allocation4], 1 }
 0x2e3   :  { %667 = vsyncpa [#allocation4 + $0x1], 1 }

</bundles_post_ra>
